<compile_context>
chip_gen: v7x
topology: tpu7x:2x2x1
jax: 0.10.0
libtpu: 0.0.40
codegen_flags: <defaults>
</compile_context>

<pallas_src>
import jax
import jax.numpy as jnp
from jax import lax
from jax.experimental import pallas as pl
from jax.experimental.pallas import tpu as pltpu


def attn_kernel(dec_ref, emb_ref, emask_ref, wt_ref, b_ref, out_ref, attn_ref):
    Bt, St, Din = dec_ref.shape
    _, Se, Dout = emb_ref.shape

    dec = dec_ref[...]            # (Bt, St, Din)
    emb = emb_ref[...]            # (Bt, Se, Dout)
    mask = emask_ref[...]         # (Bt, 1, Se) int32
    wt = wt_ref[...]              # (Din, Dout)  -- pre-transposed Linear weight
    bias = b_ref[...]             # (1, Dout)

    # ---- Linear: decsmall = dec @ W^T + b --------------------------------
    # Fold (Bt, St) into one M dimension -> a single MXU matmul per grid step.
    if St % 8 == 0 or Bt == 1:
        dec2 = dec.reshape(Bt * St, Din)
        decsmall = (jnp.dot(dec2, wt, preferred_element_type=jnp.float32)
                    + bias).reshape(Bt, St, Dout)
    else:  # layout-safe fallback for non-sublane-aligned St
        decsmall = lax.dot_general(
            dec, wt, dimension_numbers=(((2,), (0,)), ((), ())),
            preferred_element_type=jnp.float32) + bias

    # ---- scores = bmm(decsmall, emb^T), without materializing emb.T ------
    scores = lax.dot_general(
        decsmall.astype(emb.dtype), emb,
        dimension_numbers=(((2,), (2,)), ((0,), (0,))),
        preferred_element_type=jnp.float32)                     # (Bt, St, Se)

    # ---- masked_fill(emask == 0, -inf) as an additive bias ---------------
    scores = scores + jnp.where(mask == 0, -1e30, 0.0).astype(jnp.float32)

    # ---- numerically stable softmax over the last axis --------------------
    m = jnp.max(scores, axis=-1, keepdims=True)
    e = jnp.exp(scores - m)
    s = jnp.sum(e, axis=-1, keepdims=True)
    attn = e * pl.reciprocal(s, approx=False)                   # (Bt, St, Se)

    # ---- out = bmm(attn, emb) ---------------------------------------------
    out = lax.dot_general(
        attn.astype(emb.dtype), emb,
        dimension_numbers=(((2,), (1,)), ((0,), (0,))),
        preferred_element_type=jnp.float32)                     # (Bt, St, Dout)

    out_ref[...] = out.astype(out_ref.dtype)
    attn_ref[...] = attn.astype(attn_ref.dtype)


def _largest_divisor_leq(n, cap):
    for d in range(min(n, cap), 0, -1):
        if n % d == 0:
            return d
    return 1


def attn_forward(dec, emb, emask, weight, bias):
    """weight: (Dout, Din) as in torch nn.Linear; bias: (Dout,)."""
    B, Sd, Din = dec.shape
    _, Se, Dout = emb.shape

    wt = weight.T                             # (Din, Dout)
    b2 = bias.reshape(1, Dout)                # keep 2D for TPU layout
    emask_i = emask.astype(jnp.int32).reshape(B, 1, Se)

    # Fold several batches per grid step and tile Sd. Caps keep per-step VMEM
    # small enough for v7x's 64 MiB (32 MiB scoped default) while fully
    # amortizing per-step overhead at small sizes (test: grid == (1, 1)).
    Bt = _largest_divisor_leq(B, 8)
    St = _largest_divisor_leq(Sd, 256)

    grid = (B // Bt, Sd // St)

    out, attn_w = pl.pallas_call(
        attn_kernel,
        out_shape=(
            jax.ShapeDtypeStruct((B, Sd, Dout), dec.dtype),
            jax.ShapeDtypeStruct((B, Sd, Se), jnp.float32),
        ),
        grid=grid,
        in_specs=[
            pl.BlockSpec((Bt, St, Din), lambda b, s: (b, s, 0)),
            pl.BlockSpec((Bt, Se, Dout), lambda b, s: (b, 0, 0)),
            pl.BlockSpec((Bt, 1, Se), lambda b, s: (b, 0, 0)),
            pl.BlockSpec((Din, Dout), lambda b, s: (0, 0)),   # grid-invariant
            pl.BlockSpec((1, Dout), lambda b, s: (0, 0)),     # grid-invariant
        ],
        out_specs=(
            pl.BlockSpec((Bt, St, Dout), lambda b, s: (b, s, 0)),
            pl.BlockSpec((Bt, St, Se), lambda b, s: (b, s, 0)),
        ),
        compiler_params=pltpu.CompilerParams(
            dimension_semantics=("parallel", "parallel")),
    )(dec, emb, emask_i, wt, b2)
    return out, attn_w


def _reference(dec, emb, emask, weight, bias):
    decsmall = jnp.einsum("bsd,od->bso", dec, weight) + bias
    unnorm = jnp.einsum("bso,beo->bse", decsmall, emb)
    unnorm = jnp.where((emask == 0)[:, None, :], -jnp.inf, unnorm)
    attn_w = jax.nn.softmax(unnorm, axis=2)
    out = jnp.einsum("bse,beo->bso", attn_w, emb)
    return out, attn_w


if __name__ == "__main__":
    B, Sd, Se = 2, 8, 8
    linin, linout = 32, 32

    key = jax.random.PRNGKey(0)
    k_dec, k_emb, k_w, k_b, k_m = jax.random.split(key, 5)

    dec = jax.random.normal(k_dec, (B, Sd, linin), dtype=jnp.float32)
    emb = jax.random.normal(k_emb, (B, Se, linout), dtype=jnp.float32)

    # Deterministic Linear params (shapes match nn.Linear(linin, linout))
    bound = 1.0 / (linin ** 0.5)
    weight = jax.random.uniform(k_w, (linout, linin), minval=-bound, maxval=bound,
                                dtype=jnp.float32)
    bias = jax.random.uniform(k_b, (linout,), minval=-bound, maxval=bound,
                              dtype=jnp.float32)

    # emask: 1 = keep, 0 = masked; each row keeps at least one position
    emask = (jax.random.uniform(k_m, (B, Se)) > 0.3).astype(jnp.int32)
    emask = emask.at[:, 0].set(1)

    out, attn_w = attn_forward(dec, emb, emask, weight, bias)
    jax.block_until_ready((out, attn_w))

    ref_out, ref_attn = _reference(dec, emb, emask, weight, bias)
    assert jnp.allclose(out, ref_out, atol=1e-4, rtol=1e-4)
    assert jnp.allclose(attn_w, ref_attn, atol=1e-5, rtol=1e-5)

    print("KERNEL_OK")
</pallas_src>

<mosaic_0001>
module attributes {stable_mosaic.version = 11 : i64} {
  func.func @attn_kernel(%arg0: i32, %arg1: i32, %arg2: memref<2x8x32xf32, #tpu.memory_space<vmem>>, %arg3: memref<2x8x32xf32, #tpu.memory_space<vmem>>, %arg4: memref<2x1x8xi32, #tpu.memory_space<vmem>>, %arg5: memref<32x32xf32, #tpu.memory_space<vmem>>, %arg6: memref<1x32xf32, #tpu.memory_space<vmem>>, %arg7: memref<2x8x32xf32, #tpu.memory_space<vmem>>, %arg8: memref<2x8x8xf32, #tpu.memory_space<vmem>>) attributes {dimension_semantics = [#tpu.dimension_semantics<parallel>, #tpu.dimension_semantics<parallel>], iteration_bounds = array<i64: 1, 1>, scalar_prefetch = 0 : i64, scratch_operands = 0 : i64, tpu.core_type = #tpu.core_type<tc>, window_params = [{transform_indices = @transform_0, window_bounds = array<i64: 2, 8, 32>}, {transform_indices = @transform_1, window_bounds = array<i64: 2, 8, 32>}, {transform_indices = @transform_2, window_bounds = array<i64: 2, 1, 8>}, {pipeline_mode = #tpu.pipeline_mode<synchronous>, transform_indices = @transform_3, window_bounds = array<i64: 32, 32>}, {pipeline_mode = #tpu.pipeline_mode<synchronous>, transform_indices = @transform_4, window_bounds = array<i64: 1, 32>}, {transform_indices = @transform_5, window_bounds = array<i64: 2, 8, 32>}, {transform_indices = @transform_6, window_bounds = array<i64: 2, 8, 8>}]} {
    %c0 = arith.constant 0 : index
    %c0_0 = arith.constant 0 : index
    %c0_1 = arith.constant 0 : index
    %0 = vector.load %arg2[%c0, %c0_0, %c0_1] : memref<2x8x32xf32, #tpu.memory_space<vmem>>, vector<2x8x32xf32>
    %c0_2 = arith.constant 0 : index
    %c0_3 = arith.constant 0 : index
    %c0_4 = arith.constant 0 : index
    %1 = vector.load %arg3[%c0_2, %c0_3, %c0_4] : memref<2x8x32xf32, #tpu.memory_space<vmem>>, vector<2x8x32xf32>
    %c0_5 = arith.constant 0 : index
    %c0_6 = arith.constant 0 : index
    %c0_7 = arith.constant 0 : index
    %2 = vector.load %arg4[%c0_5, %c0_6, %c0_7] : memref<2x1x8xi32, #tpu.memory_space<vmem>>, vector<2x1x8xi32>
    %c0_8 = arith.constant 0 : index
    %c0_9 = arith.constant 0 : index
    %3 = vector.load %arg5[%c0_8, %c0_9] : memref<32x32xf32, #tpu.memory_space<vmem>>, vector<32x32xf32>
    %c0_10 = arith.constant 0 : index
    %c0_11 = arith.constant 0 : index
    %4 = vector.load %arg6[%c0_10, %c0_11] : memref<1x32xf32, #tpu.memory_space<vmem>>, vector<1x32xf32>
    %5 = vector.shape_cast %0 : vector<2x8x32xf32> to vector<16x32xf32>
    %cst = arith.constant dense<0.000000e+00> : vector<16x32xf32>
    %6 = tpu.matmul %5, %3, %cst {dimension_numbers = #tpu.dot_dimension_numbers<[1], [0], [0], [1], [0, 0, 1, 1], [], []>} : vector<16x32xf32>, vector<32x32xf32>, vector<16x32xf32> -> vector<16x32xf32>
    %7 = vector.broadcast %4 : vector<1x32xf32> to vector<16x32xf32>
    %8 = arith.addf %6, %7 : vector<16x32xf32>
    %9 = vector.shape_cast %8 : vector<16x32xf32> to vector<2x8x32xf32>
    %cst_12 = arith.constant dense<0.000000e+00> : vector<2x8x8xf32>
    %10 = tpu.matmul %9, %1, %cst_12 {dimension_numbers = #tpu.dot_dimension_numbers<[2], [2], [1], [1], [0, 0, 0, 1, 1, 1], [0], [0]>} : vector<2x8x32xf32>, vector<2x8x32xf32>, vector<2x8x8xf32> -> vector<2x8x8xf32>
    %c0_i32 = arith.constant 0 : i32
    %11 = vector.broadcast %c0_i32 : i32 to vector<2x1x8xi32>
    %12 = arith.cmpi eq, %2, %11 : vector<2x1x8xi32>
    %cst_13 = arith.constant -1.000000e+30 : f32
    %cst_14 = arith.constant 0.000000e+00 : f32
    %13 = vector.broadcast %cst_13 : f32 to vector<2x1x8xf32>
    %14 = vector.broadcast %cst_14 : f32 to vector<2x1x8xf32>
    %15 = arith.select %12, %13, %14 : vector<2x1x8xi1>, vector<2x1x8xf32>
    %16 = vector.broadcast %15 : vector<2x1x8xf32> to vector<2x8x8xf32>
    %17 = arith.addf %10, %16 : vector<2x8x8xf32>
    %cst_15 = arith.constant dense<0xFF800000> : vector<2x8xf32>
    %18 = vector.multi_reduction <maximumf>, %17, %cst_15 [2] : vector<2x8x8xf32> to vector<2x8xf32>
    %19 = vector.shape_cast %18 : vector<2x8xf32> to vector<2x8x1xf32>
    %20 = vector.broadcast %19 : vector<2x8x1xf32> to vector<2x8x8xf32>
    %21 = arith.subf %17, %20 : vector<2x8x8xf32>
    %22 = math.exp %21 : vector<2x8x8xf32>
    %cst_16 = arith.constant dense<0.000000e+00> : vector<2x8xf32>
    %23 = vector.multi_reduction <add>, %22, %cst_16 [2] : vector<2x8x8xf32> to vector<2x8xf32>
    %24 = vector.shape_cast %23 : vector<2x8xf32> to vector<2x8x1xf32>
    %25 = tpu.reciprocal %24 : vector<2x8x1xf32> -> vector<2x8x1xf32>
    %26 = vector.broadcast %25 : vector<2x8x1xf32> to vector<2x8x8xf32>
    %27 = arith.mulf %22, %26 : vector<2x8x8xf32>
    %cst_17 = arith.constant dense<0.000000e+00> : vector<2x8x32xf32>
    %28 = tpu.matmul %27, %1, %cst_17 {dimension_numbers = #tpu.dot_dimension_numbers<[2], [1], [1], [2], [0, 0, 0, 1, 1, 2], [0], [0]>} : vector<2x8x8xf32>, vector<2x8x32xf32>, vector<2x8x32xf32> -> vector<2x8x32xf32>
    %c0_18 = arith.constant 0 : index
    %c0_19 = arith.constant 0 : index
    %c0_20 = arith.constant 0 : index
    %29 = vector.load %arg7[%c0_18, %c0_19, %c0_20] : memref<2x8x32xf32, #tpu.memory_space<vmem>>, vector<2x8x32xf32>
    tpu.vector_store %arg7[%c0_18, %c0_19, %c0_20], %28 {strides = array<i32>} : memref<2x8x32xf32, #tpu.memory_space<vmem>>, vector<2x8x32xf32>,
    %c0_21 = arith.constant 0 : index
    %c0_22 = arith.constant 0 : index
    %c0_23 = arith.constant 0 : index
    %30 = vector.load %arg8[%c0_21, %c0_22, %c0_23] : memref<2x8x8xf32, #tpu.memory_space<vmem>>, vector<2x8x8xf32>
    tpu.vector_store %arg8[%c0_21, %c0_22, %c0_23], %27 {strides = array<i32>} : memref<2x8x8xf32, #tpu.memory_space<vmem>>, vector<2x8x8xf32>,
    return
  }
  func.func @transform_0(%arg0: i32, %arg1: i32) -> (i32, i32, i32) {
    %c0_i32 = arith.constant 0 : i32
    %c0_i32_0 = arith.constant 0 : i32
    return %arg0, %arg1, %c0_i32 : i32, i32, i32
  }
  func.func @transform_1(%arg0: i32, %arg1: i32) -> (i32, i32, i32) {
    %c0_i32 = arith.constant 0 : i32
    %c0_i32_0 = arith.constant 0 : i32
    %c0_i32_1 = arith.constant 0 : i32
    return %arg0, %c0_i32, %c0_i32_0 : i32, i32, i32
  }
  func.func @transform_2(%arg0: i32, %arg1: i32) -> (i32, i32, i32) {
    %c0_i32 = arith.constant 0 : i32
    %c0_i32_0 = arith.constant 0 : i32
    %c0_i32_1 = arith.constant 0 : i32
    return %arg0, %c0_i32, %c0_i32_0 : i32, i32, i32
  }
  func.func @transform_3(%arg0: i32, %arg1: i32) -> (i32, i32) {
    %c0_i32 = arith.constant 0 : i32
    %c0_i32_0 = arith.constant 0 : i32
    %c0_i32_1 = arith.constant 0 : i32
    return %c0_i32, %c0_i32_0 : i32, i32
  }
  func.func @transform_4(%arg0: i32, %arg1: i32) -> (i32, i32) {
    %c0_i32 = arith.constant 0 : i32
    %c0_i32_0 = arith.constant 0 : i32
    %c0_i32_1 = arith.constant 0 : i32
    return %c0_i32, %c0_i32_0 : i32, i32
  }
  func.func @transform_5(%arg0: i32, %arg1: i32) -> (i32, i32, i32) {
    %c0_i32 = arith.constant 0 : i32
    %c0_i32_0 = arith.constant 0 : i32
    return %arg0, %arg1, %c0_i32 : i32, i32, i32
  }
  func.func @transform_6(%arg0: i32, %arg1: i32) -> (i32, i32, i32) {
    %c0_i32 = arith.constant 0 : i32
    %c0_i32_0 = arith.constant 0 : i32
    return %arg0, %arg1, %c0_i32 : i32, i32, i32
  }
}

</mosaic_0001>

<bundles_post_ra>
// kernel: tpu_custom_call.1
= control target key start
LH: loop header
LB: loop body
LE: loop exit
PB: predicated region body
PF: predicated region fallthrough
CT: control target
= control target key end

     0   :  { %12 = vsyncpa [#allocation3], 0  ;;  %s887_s0 = inlined_call_operand.hbm [shape: f32[2,8,32], index: 0, kind: input, shape index: {}]   ;;  %s888_s1 = inlined_call_operand.hbm [shape: f32[2,8,32], index: 1, kind: input, shape index: {}]   ;;  %s889_s2 = inlined_call_operand.vmem [shape: s32[2,1,8], index: 2, kind: input, shape index: {}]   ;;  %s890_s3 = inlined_call_operand.hbm [shape: f32[32,32], index: 3, kind: input, shape index: {}]   ;;  %s891_s4 = inlined_call_operand.vmem [shape: f32[1,32], index: 4, kind: input, shape index: {}]   ;;  %s892_s5 = inlined_call_operand.hbm [shape: f32[2,8,32], index: 5, kind: output, shape index: {0}]   ;;  %s893_s6 = inlined_call_operand.hbm [shape: f32[2,8,8], index: 6, kind: output, shape index: {1}]  }
   0x1   :  { %13 = vsyncpa [#allocation6], 0 }
   0x2   :  { %14 = vsyncpa [#allocation4], 0 }
   0x3   :  { %15 = vsyncpa [#allocation10], 0  ;;  %s736_s21 = smov [#allocation5]   ;;  %s737_s23 = smov [#allocation2]  }
   0x4   :  { %s33_s22 = sshll.u32 %s736_s21, 4  ;;  %s21_s24 = sshll.u32 %s737_s23, 4  ;;  %s34_s22 = int_to_ptr.vmem [resolvable:$true] %s33_s22  ;;  %s780_s24 = int_to_ptr.vmem [resolvable:$true] %s21_s24 }
   0x5   :  { %s618_s27 = scalar_lea.hbm %s888_s1, 256 }
   0x6   :  { %p619_p0 = scmp.ne.s32.totalorder %s888_s1, %s618_s27  ;;  %p622_p1 = scmp.lt.u32.totalorder %s618_s27, %s888_s1 }
   0x8   :  { %p624_p2 = pnand %p622_p1, %p619_p0 }
   0xa   :  { %627 = shalt.err (!%p624_p2)
}
   0xb   :  { %s628_s8 = scalar_lea.vmem %s34_s22, 256  ;;  %p633_p4 = scmp.lt.s32.totalorder %s34_s22, %s34_s22 }
   0xc   :  { %p629_p3 = scmp.ne.s32.totalorder %s34_s22, %s628_s8  ;;  %p634_p5 = scmp.lt.s32.totalorder %s628_s8, %s628_s8 }
   0xe   :  { %p635_p6 = por %p634_p5, %p633_p4 }
  0x10   :  { %p636_p7 = pnand %p635_p6, %p629_p3 }
  0x12   :  { %639 = shalt.err (!%p636_p7)
}
  0x13   :  { %s738_s9 = smov 128   ;;  %s739_s10 = smov 8  }
  0x14   :  { %39 = dma.hbm_to_vmem [thread:$0]  %s888_s1, 256, %s34_s22, [#allocation6], %s738_s9, %s738_s9, %s739_s10  }
  0x15   :  { %s640_s15 = scalar_lea.hbm %s887_s0, 256 }
  0x16   :  { %p641_p8 = scmp.ne.s32.totalorder %s887_s0, %s640_s15  ;;  %p644_p9 = scmp.lt.u32.totalorder %s640_s15, %s887_s0 }
  0x18   :  { %p646_p10 = pnand %p644_p9, %p641_p8 }
  0x1a   :  { %649 = shalt.err (!%p646_p10)
}
  0x1b   :  { %s650_s20 = scalar_lea.vmem %s780_s24, 256  ;;  %p655_p12 = scmp.lt.s32.totalorder %s780_s24, %s780_s24 }
  0x1c   :  { %p651_p11 = scmp.ne.s32.totalorder %s780_s24, %s650_s20  ;;  %p656_p13 = scmp.lt.s32.totalorder %s650_s20, %s650_s20 }
  0x1e   :  { %p657_p0 = por %p656_p13, %p655_p12 }
  0x20   :  { %p658_p1 = pnand %p657_p0, %p651_p11 }
  0x22   :  { %661 = shalt.err (!%p658_p1)
}
  0x23   :  { %27 = dma.hbm_to_vmem [thread:$0]  %s887_s0, 256, %s780_s24, [#allocation3], %s738_s9, %s738_s9, %s739_s10  }
  0x24   :  { %s740_s22 = smov [#allocation7]   ;;  %s662_s27 = scalar_lea.hbm %s890_s3, 512 }
  0x25   :  { %s47_s23 = sshll.u32 %s740_s22, 4  ;;  %p663_p2 = scmp.ne.s32.totalorder %s890_s3, %s662_s27  ;;  %s48_s23 = int_to_ptr.vmem [resolvable:$true] %s47_s23 }
  0x26   :  { %p666_p3 = scmp.lt.u32.totalorder %s662_s27, %s890_s3 }
  0x28   :  { %p668_p4 = pnand %p666_p3, %p663_p2 }
  0x2a   :  { %671 = shalt.err (!%p668_p4)
}
  0x2b   :  { %s672_s8 = scalar_lea.vmem %s48_s23, 512  ;;  %p677_p6 = scmp.lt.s32.totalorder %s48_s23, %s48_s23 }
  0x2c   :  { %p673_p5 = scmp.ne.s32.totalorder %s48_s23, %s672_s8  ;;  %p678_p7 = scmp.lt.s32.totalorder %s672_s8, %s672_s8 }
  0x2e   :  { %p679_p8 = por %p678_p7, %p677_p6 }
  0x30   :  { %p680_p9 = pnand %p679_p8, %p673_p5 }
  0x32   :  { %683 = shalt.err (!%p680_p9)
}
  0x33   :  { %53 = dma.hbm_to_vmem [thread:$0]  %s890_s3, 512, %s48_s23, [#allocation6], %s738_s9, %s738_s9, %s739_s10  }
  0x34   :  { %728 = dma.done.wait [#allocation3], 256  }
  0x35   :  { %729 = vsyncadd [#allocation3], 4294967040 }
  0x36   :  { %730 = dma.done.wait [#allocation6], 768  }
  0x37   :  { %731 = vsyncadd [#allocation6], 4294966528  ;;  %v741_v0 = vmov 0.0   ;;  %vm82_vm0 = vcmask 261120   ;;  %v71_v1 = vld [vmem:[#allocation7] sm:$0xff]  ;;  %v72_v2 = vld [vmem:[#allocation7 + $0x8] sm:$0xff]  ;;  %v170_v16 = vlaneseq }
  0x38   :  { %573 = vmatprep.subr.mxu1 %v741_v0  ;;  %v73_v3 = vld [vmem:[#allocation7 + $0x10] sm:$0xff]  ;;  %v593_v4 = vpack.c.bf16 %v72_v2, %v71_v1  ;;  %v74_v5 = vld [vmem:[#allocation7 + $0x18] sm:$0xff]  ;;  %v65_v6 = vld [vmem:[#allocation2] sm:$0xff]  ;;  %vm742_vm1 = vmmov 0   ;;  %vm332_vm4 = vcmask 64512  }
  0x39   :  { %v597_v7 = vpack.c.bf16 %v74_v5, %v73_v3  ;;  %570 = vmatprep.mubr.msk.f32.mxu0 %vm82_vm0, %v65_v6  ;;  %v66_v8 = vld [vmem:[#allocation2 + $0x8] sm:$0xff]  ;;  %v67_v9 = vld [vmem:[#allocation5] sm:$0xff]  ;;  %575 = vmatprep.mubr.msk.f32.mxu1 %vm742_vm1, %v741_v0  ;;  %v539_v10 = vld [vmem:[%s891_s4] ss:$0 sm:$0xff]  ;;  %v171_v18 = vshrl.u32 %v170_v16, 7 }
  0x3a   :  { %594 = vmatprep.subr.bf16.mxu0 %v593_v4  ;;  %574 = vmatpush3.xpose.msk.msra.mxu1 %vm82_vm0, %v67_v9  ;;  %v68_v14 = vld [vmem:[#allocation5 + $0x8] sm:$0xff]  ;;  %v69_v17 = vld [vmem:[%s889_s2] sm:$0x1]  ;;  %v70_v19 = vld [vmem:[%s889_s2 + $0x1] sm:$0x1]  ;;  %s743_s2 = smov [#allocation9]  }
  0x3b   :  { %596 = vmatpush3.bf16.msra.mxu0 %v593_v4  ;;  %578 = vmatprep.subr.mxu1 %v741_v0  ;;  %vm164_vm2 = vcmp.eq.s32.totalorder %v69_v17, 0  ;;  %v172_v20 = vsub.s32 0, %v171_v18  ;;  %vm165_vm3 = vcmp.eq.s32.totalorder %v70_v19, 0  ;;  %s522_s15 = sshll.u32 %s743_s2, 4  ;;  %s523_s15 = int_to_ptr.vmem [resolvable:$true] %s522_s15 }
  0x3c   :  { %598 = vmatprep.subr.bf16.mxu0 %v597_v7  ;;  %v166_v21 = vsel %vm164_vm2, -1e+30, %v741_v0  ;;  %v167_v23 = vsel %vm165_vm3, -1e+30, %v741_v0  ;;  %s684_s16 = scalar_lea.vmem %s523_s15, 256  ;;  %p689_p11 = scmp.lt.s32.totalorder %s523_s15, %s523_s15 }
  0x3d   :  { %v173_v22 = vrot.slane %v166_v21, %v172_v20  ;;  %v177_v27 = vrot.slane %v167_v23, %v172_v20  ;;  %p685_p10 = scmp.ne.s32.totalorder %s523_s15, %s684_s16  ;;  %p690_p12 = scmp.lt.s32.totalorder %s684_s16, %s684_s16 }
  0x3f   :  { %600 = vmatpush3.bf16.msra.mxu0 %v597_v7  ;;  %p691_p13 = por %p690_p12, %p689_p11 }
  0x40   :  { %583 = vmatprep.subr.mxu0 %v741_v0 }
  0x41   :  { %p692_p0 = pnand %p691_p13, %p685_p10 }
  0x42   :  { %571 = vmatmul.mubr.msk.f32.vlgmr.msra.gmra.mrb[0].mxu0 %vm82_vm0, %v66_v8 }
  0x43   :  { %584 = vmatpush3.msra.mxu0 %v67_v9  ;;  %585 = vmatprep.mubr.msk.f32.mxu0 %vm742_vm1, %v741_v0 }
 0x115   :  { %v572_v11 = vpop.f32.mrb[0].mxu0 }
 0x116   :  { %v155_v12 = vpop.f32.mrb[1].mxu0  ;;  %v161_v15 = vadd.f32 %v572_v11, %v539_v10 }
 0x117   :  { %v156_v13 = vadd.f32 %v539_v10, %v155_v12 }
 0x119   :  { %576 = vmatmul.mubr.msk.f32.vlgmr.msra.gmra.mrb[0].mxu1 %vm82_vm0, %v156_v13 }
 0x11a   :  { %579 = vmatpush3.xpose.msk.msra.mxu1 %vm82_vm0, %v68_v14  ;;  %580 = vmatprep.mubr.msk.f32.mxu1 %vm742_vm1, %v741_v0 }
 0x11b   :  { %588 = vmatprep.subr.mxu1 %v741_v0 }
 0x11d   :  { %581 = vmatmul.mubr.msk.f32.vlgmr.msra.gmra.mrb[2].mxu1 %vm82_vm0, %v161_v15 }
 0x11e   :  { %589 = vmatpush3.msra.mxu1 %v68_v14  ;;  %590 = vmatprep.mubr.msk.f32.mxu1 %vm742_vm1, %v741_v0 }
 0x1ec   :  { %v252_v24 = vpop.f32.mrb[0].mxu1 }
 0x1ed   :  { %v253_v25 = vadd.f32 %v252_v24, %v173_v22  ;;  %v577_v26 = vpop.f32.mrb[1].mxu1 }
 0x1ef   :  { %v333_v28 = vsel %vm332_vm4, %v253_v25, -inf }
 0x1f0   :  { %334 = vmax.xlane.f32.xlu0 %v333_v28  ;;  %v328_v29 = vpop.f32.mrb[2].mxu1 }
 0x1f1   :  { %v329_v30 = vadd.f32 %v328_v29, %v177_v27  ;;  %v582_v31 = vpop.f32.mrb[3].mxu1 }
 0x1f3   :  { %v336_v32 = vsel %vm332_vm4, %v329_v30, -inf }
 0x1f4   :  { %337 = vmax.xlane.f32.xlu0 %v336_v32 }
 0x27d   :  { %v335_v33 = vpop.xlane.xlu0 %334 }
 0x27e   :  { %v339_v34 = vsub.f32 %v253_v25, %v335_v33 }
 0x280   :  { %v341_v35 = vmul.f32 1.442695, %v339_v34 }
 0x281   :  { %v338_v36 = vpop.xlane.xlu0 %337 }
 0x282   :  { %610 = vpow2.f32 %v341_v35  ;;  %v340_v37 = vsub.f32 %v329_v30, %v338_v36 }
 0x284   :  { %v343_v38 = vmul.f32 1.442695, %v340_v37 }
 0x286   :  { %612 = vpow2.f32 %v343_v38 }
 0x28c   :  { %v611_v39 = vpop.eup %610 }
 0x28d   :  { %v345_v40 = vsel %vm332_vm4, %v611_v39, 0.0 }
 0x28e   :  { %346 = vadd.xlane.f32.xlu1 %v345_v40 }
 0x290   :  { %v613_v41 = vpop.eup %612 }
 0x291   :  { %v348_v42 = vsel %vm332_vm4, %v613_v41, 0.0 }
 0x292   :  { %349 = vadd.xlane.f32.xlu1 %v348_v42 }
 0x31b   :  { %v347_v43 = vpop.xlane.xlu1 %346 }
 0x31c   :  { %614 = vrcp.f32 %v347_v43 }
 0x31f   :  { %v350_v44 = vpop.xlane.xlu1 %349 }
 0x320   :  { %616 = vrcp.f32 %v350_v44 }
 0x326   :  { %v615_v45 = vpop.eup %614 }
 0x327   :  { %v353_v46 = vmul.f32 %v615_v45, %v611_v39 }
 0x329   :  { %503 = vst.msk [vmem:[#allocation9] sm:$0xff] %vm332_vm4, %v353_v46  ;;  %586 = vmatmul.mubr.msk.f32.vlgmr.msra.gmra.mrb[2].mxu0 %vm332_vm4, %v353_v46 }
 0x32a   :  { %v617_v47 = vpop.eup %616 }
 0x32b   :  { %v354_v48 = vmul.f32 %v617_v47, %v613_v41 }
 0x32d   :  { %504 = vst.msk [vmem:[#allocation9 + $0x8] sm:$0xff] %vm332_vm4, %v354_v48  ;;  %591 = vmatmul.mubr.msk.f32.vlgmr.msra.gmra.mrb[4].mxu1 %vm332_vm4, %v354_v48 }
 0x32e   :  { %695 = shalt.err (!%p692_p0)
}
 0x32f   :  { %s696_s19 = scalar_lea.hbm %s893_s6, 256 }
 0x330   :  { %p697_p1 = scmp.ne.s32.totalorder %s893_s6, %s696_s19  ;;  %p700_p2 = scmp.lt.u32.totalorder %s696_s19, %s893_s6 }
 0x332   :  { %p702_p3 = pnand %p700_p2, %p697_p1 }
 0x334   :  { %705 = shalt.err (!%p702_p3)
}
 0x335   :  { %528 = dma.vmem_to_hbm [thread:$0]  %s523_s15, 256, %s893_s6, [#allocation10], %s738_s9, %s738_s9, %s739_s10  }
 0x336   :  { %s744_s26 = smov [#allocation8]  }
 0x337   :  { %s510_s27 = sshll.u32 %s744_s26, 4  ;;  %s511_s27 = int_to_ptr.vmem [resolvable:$true] %s510_s27 }
 0x338   :  { %s706_s28 = scalar_lea.vmem %s511_s27, 256  ;;  %p711_p5 = scmp.lt.s32.totalorder %s511_s27, %s511_s27 }
 0x339   :  { %p707_p4 = scmp.ne.s32.totalorder %s511_s27, %s706_s28  ;;  %p712_p6 = scmp.lt.s32.totalorder %s706_s28, %s706_s28 }
 0x33b   :  { %p713_p7 = por %p712_p6, %p711_p5 }
 0x33d   :  { %p714_p8 = pnand %p713_p7, %p707_p4 }
 0x3fc   :  { %v424_v49 = vpop.f32.mrb[2].mxu0 }
 0x3fd   :  { %501 = vst.msk [vmem:[#allocation8] sm:$0xff] %vm82_vm0, %v424_v49  ;;  %v587_v50 = vpop.f32.mrb[3].mxu0 }
 0x400   :  { %v497_v51 = vpop.f32.mrb[4].mxu1 }
 0x401   :  { %502 = vst.msk [vmem:[#allocation8 + $0x8] sm:$0xff] %vm82_vm0, %v497_v51  ;;  %v592_v52 = vpop.f32.mrb[5].mxu1 }
 0x402   :  { %717 = shalt.err (!%p714_p8)
}
 0x403   :  { %s718_s30 = scalar_lea.hbm %s892_s5, 256 }
 0x404   :  { %p719_p9 = scmp.ne.s32.totalorder %s892_s5, %s718_s30  ;;  %p722_p10 = scmp.lt.u32.totalorder %s718_s30, %s892_s5 }
 0x406   :  { %p724_p11 = pnand %p722_p10, %p719_p9 }
 0x408   :  { %727 = shalt.err (!%p724_p11)
}
 0x409   :  { %516 = dma.vmem_to_hbm [thread:$0]  %s511_s27, 256, %s892_s5, [#allocation4], %s738_s9, %s738_s9, %s739_s10  }
 0x40a   :  { %732 = dma.done.wait [#allocation4], 256  }
 0x40b   :  { %733 = vsyncadd [#allocation4], 4294967040 }
 0x40c   :  { %734 = dma.done.wait [#allocation10], 256  }
 0x40d   :  { %735 = vsyncadd [#allocation10], 4294967040 }
 0x40e   :  { %535 = vsyncpa [#allocation3], 1 }
 0x40f   :  { %536 = vsyncpa [#allocation6], 1 }
 0x410   :  { %537 = vsyncpa [#allocation4], 1 }
 0x411   :  { %538 = vsyncpa [#allocation10], 1 }

</bundles_post_ra>
